<compile_context>
chip_gen: v7x
topology: tpu7x:2x2x1
jax: 0.10.0
libtpu: 0.0.40
codegen_flags: <defaults>
</compile_context>

<pallas_src>
import functools

import numpy as np
import jax
import jax.numpy as jnp
from jax import lax
from jax.experimental import pallas as pl
from jax.experimental.pallas import tpu as pltpu


def _bilstm_kernel(
    x_ref,                           # (Tc*Bp, E) bf16 — current time chunk
    wih_f_ref, whh_f_ref, b_f_ref,   # forward LSTM weights (bf16, bf16, f32)
    wih_b_ref, b_b_ref,              # backward direction (only t=T-1 step used)
    wo_ref, bo_ref,                  # hidden2label (bf16, f32)
    out_ref,                         # (Bp, L) f32 log-probs
    xw_ref,                          # (Tc*Bp, 4H) bf16 scratch: chunk x@W_ih + b
    h_ref, c_ref,                    # (Bp, H) f32 carry across time chunks
    *, hidden_dim, chunk_len, batch_pad,
):
    H, Tc, Bp = hidden_dim, chunk_len, batch_pad
    t_chunk = pl.program_id(0)
    n_chunk = pl.num_programs(0)

    @pl.when(t_chunk == 0)
    def _init():
        h_ref[...] = jnp.zeros_like(h_ref)
        c_ref[...] = jnp.zeros_like(c_ref)

    # Per-lane activation constants: sigmoid for the i/f/o gate lanes via
    # 0.5*tanh(0.5*x)+0.5, plain tanh for the g lanes — ONE full-width tanh.
    lane = lax.broadcasted_iota(jnp.int32, (1, 4 * H), 1)
    is_g_lane = jnp.logical_and(lane >= 2 * H, lane < 3 * H)
    scale = jnp.where(is_g_lane, 1.0, 0.5).astype(jnp.float32)
    offset = jnp.where(is_g_lane, 0.0, 0.5).astype(jnp.float32)

    def gate_act(g):                      # g: (Bp, 4H) f32, PyTorch order i,f,g,o
        a = scale * jnp.tanh(scale * g) + offset
        return a[:, 0:H], a[:, H:2 * H], a[:, 2 * H:3 * H], a[:, 3 * H:4 * H]

    # Phase 1: forward-direction input projection for the whole chunk in one
    # bf16 MXU pass (f32 accumulation), bias folded in, stored bf16.
    xw_ref[...] = (
        jnp.dot(x_ref[...], wih_f_ref[...], preferred_element_type=jnp.float32)
        + b_f_ref[...]
    ).astype(xw_ref.dtype)

    whh_f = whh_f_ref[...]                # bf16 (H, 4H), resident for the chunk

    # Phase 2: serial forward recurrence over this chunk — one small
    # (Bp,H)@(H,4H) bf16 matmul + one full-width tanh per step.
    def step(t, carry):
        h, c = carry
        row = pl.multiple_of(t * Bp, Bp)
        g = xw_ref[pl.ds(row, Bp), :].astype(jnp.float32) + jnp.dot(
            h.astype(whh_f.dtype), whh_f, preferred_element_type=jnp.float32)
        i, f, gg, o = gate_act(g)
        c_new = f * c + i * gg
        h_new = o * jnp.tanh(c_new)
        return h_new, c_new

    h_fwd, c_fwd = lax.fori_loop(
        0, Tc, step, (h_ref[...], c_ref[...]), unroll=min(Tc, 4))
    h_ref[...] = h_fwd
    c_ref[...] = c_fwd

    # Phase 3+4 (last chunk only): single backward-direction step at position
    # T-1 from the zero state, then hidden2label + log_softmax.
    @pl.when(t_chunk == n_chunk - 1)
    def _finalize():
        x_last = x_ref[pl.ds((Tc - 1) * Bp, Bp), :]
        g_b = (
            jnp.dot(x_last, wih_b_ref[...], preferred_element_type=jnp.float32)
            + b_b_ref[...]
        )
        i_b, _, gg_b, o_b = gate_act(g_b)
        h_bwd = o_b * jnp.tanh(i_b * gg_b)

        # hidden2label: split W at sublane row H — no lane-dim concat needed.
        wo_top = wo_ref[pl.ds(0, H), :]
        wo_bot = wo_ref[pl.ds(H, H), :]
        y = (
            jnp.dot(h_fwd.astype(wo_top.dtype), wo_top,
                    preferred_element_type=jnp.float32)
            + jnp.dot(h_bwd.astype(wo_bot.dtype), wo_bot,
                      preferred_element_type=jnp.float32)
            + bo_ref[...]
        )
        m = jnp.max(y, axis=-1, keepdims=True)
        z = y - m
        lse = jnp.log(jnp.sum(jnp.exp(z), axis=-1, keepdims=True))
        out_ref[...] = z - lse


def _padded_bytes(shape, dtype):
    """Bytes of a 2-D buffer padded to its native (sublane, 128) VMEM tile."""
    item = np.dtype(dtype).itemsize
    sublane = max(8, 32 // item)          # 8 rows f32, 16 bf16, 32 int8
    rows = ((shape[-2] + sublane - 1) // sublane) * sublane
    cols = ((shape[-1] + 127) // 128) * 128
    lead = 1
    for d in shape[:-2]:
        lead *= int(d)
    return lead * rows * cols * item


def bilstm_sentiment_forward(sentence, params, *, hidden_dim, label_size,
                             time_chunk=None):
    """sentence: (T, B) int32 token ids. Returns (B, label_size) f32 log-probs."""
    emb = params["embeddings"]
    x = jnp.take(emb, sentence, axis=0)   # (T, B, E) — gather glue in plain JAX
    T, B, E = x.shape
    H, L = hidden_dim, label_size
    bf = jnp.bfloat16

    # Pad batch to the bf16 sublane packing (16) so per-step row slices of the
    # bf16 buffers stay tile-aligned (and MXU rows are better filled).
    SUB = 16
    Bp = ((B + SUB - 1) // SUB) * SUB
    if Bp != B:
        x = jnp.pad(x, ((0, 0), (0, Bp - B), (0, 0)))

    # Time chunk must divide T exactly (time padding would change h_fwd).
    if time_chunk is None:
        time_chunk = T
    Tc = max(d for d in range(1, min(time_chunk, T) + 1) if T % d == 0)
    n_chunk = T // Tc

    x2d = x.reshape(T * Bp, E).astype(bf)          # free reshape, bf16 operand

    wih_f = params["wih_f"].astype(bf)
    whh_f = params["whh_f"].astype(bf)
    wih_b = params["wih_b"].astype(bf)
    w_out = params["w_out"].astype(bf)
    b_f, b_b, b_out = params["b_f"], params["b_b"], params["b_out"]   # f32

    full = lambda shape: pl.BlockSpec(shape, lambda t: (0,) * len(shape))

    grid_spec = pltpu.PrefetchScalarGridSpec(
        num_scalar_prefetch=0,
        grid=(n_chunk,),
        in_specs=[
            pl.BlockSpec((Tc * Bp, E), lambda t: (t, 0)),  # x chunk (pipelined)
            full((E, 4 * H)), full((H, 4 * H)), full((1, 4 * H)),   # fwd weights
            full((E, 4 * H)), full((1, 4 * H)),                     # bwd weights
            full((2 * H, L)), full((1, L)),                         # hidden2label
        ],
        out_specs=full((Bp, L)),
        scratch_shapes=[
            pltpu.VMEM((Tc * Bp, 4 * H), bf),          # chunk x @ W_ih (bf16)
            pltpu.VMEM((Bp, H), jnp.float32),          # h carry
            pltpu.VMEM((Bp, H), jnp.float32),          # c carry
        ],
    )

    # Explicit VMEM limit sized from the actual (tile-padded, double-buffered)
    # buffers + margin; clamped to sane bounds.
    in_bufs = [
        ((Tc * Bp, E), bf),
        ((E, 4 * H), bf), ((H, 4 * H), bf), ((1, 4 * H), jnp.float32),
        ((E, 4 * H), bf), ((1, 4 * H), jnp.float32),
        ((2 * H, L), bf), ((1, L), jnp.float32),
    ]
    scratch_bufs = [((Tc * Bp, 4 * H), bf),
                    ((Bp, H), jnp.float32), ((Bp, H), jnp.float32)]
    out_bufs = [((Bp, L), jnp.float32)]
    vmem_bytes = (2 * sum(_padded_bytes(s, d) for s, d in in_bufs)
                  + 2 * sum(_padded_bytes(s, d) for s, d in out_bufs)
                  + sum(_padded_bytes(s, d) for s, d in scratch_bufs))
    vmem_limit = int(min(128 * 1024 * 1024,
                         max(16 * 1024 * 1024, 2 * vmem_bytes + (4 << 20))))

    out = pl.pallas_call(
        functools.partial(_bilstm_kernel, hidden_dim=H, chunk_len=Tc,
                          batch_pad=Bp),
        out_shape=jax.ShapeDtypeStruct((Bp, L), jnp.float32),
        grid_spec=grid_spec,
        compiler_params=pltpu.CompilerParams(
            dimension_semantics=("arbitrary",),      # carried recurrence axis
            vmem_limit_bytes=vmem_limit),
    )(
        x2d,
        wih_f, whh_f, b_f,
        wih_b, b_b,
        w_out, b_out,
    )
    return out[:B]


def init_params(key, vocab_size, embedding_dim, hidden_dim, label_size):
    E, H, L = embedding_dim, hidden_dim, label_size
    ks = jax.random.split(key, 10)
    s = 0.1
    return {
        "embeddings": jax.random.normal(ks[0], (vocab_size, E), jnp.float32) * s,
        "wih_f": jax.random.normal(ks[1], (E, 4 * H), jnp.float32) * s,
        "whh_f": jax.random.normal(ks[2], (H, 4 * H), jnp.float32) * s,
        "b_f": jax.random.normal(ks[3], (1, 4 * H), jnp.float32) * s,
        "wih_b": jax.random.normal(ks[4], (E, 4 * H), jnp.float32) * s,
        "whh_b": jax.random.normal(ks[5], (H, 4 * H), jnp.float32) * s,  # unused: see note
        "b_b": jax.random.normal(ks[6], (1, 4 * H), jnp.float32) * s,
        "w_out": jax.random.normal(ks[7], (2 * H, L), jnp.float32) * s,
        "b_out": jax.random.normal(ks[8], (1, L), jnp.float32) * s,
    }


def reference_forward(sentence, params, *, hidden_dim, label_size):
    """Pure-JAX reference matching nn.LSTM(bidirectional=True) -> lstm_out[-1]
    semantics, mirroring the kernel's bf16-operand / bf16-stored-projection
    precision policy (gate math in f32)."""
    H = hidden_dim
    bf = jnp.bfloat16
    x = jnp.take(params["embeddings"], sentence, axis=0).astype(bf)  # (T,B,E)
    T, B, _ = x.shape
    wih_f = params["wih_f"].astype(bf)
    whh_f = params["whh_f"].astype(bf)
    wih_b = params["wih_b"].astype(bf)
    w_out = params["w_out"].astype(bf)

    def act4(g):
        i = jax.nn.sigmoid(g[:, :H])
        f = jax.nn.sigmoid(g[:, H:2 * H])
        gg = jnp.tanh(g[:, 2 * H:3 * H])
        o = jax.nn.sigmoid(g[:, 3 * H:4 * H])
        return i, f, gg, o

    h = jnp.zeros((B, H), jnp.float32)
    c = jnp.zeros((B, H), jnp.float32)
    for t in range(T):
        pre = (jnp.dot(x[t], wih_f, preferred_element_type=jnp.float32)
               + params["b_f"]).astype(bf).astype(jnp.float32)
        g = pre + jnp.dot(h.astype(bf), whh_f, preferred_element_type=jnp.float32)
        i, f, gg, o = act4(g)
        c = f * c + i * gg
        h = o * jnp.tanh(c)

    # Backward-direction output at position T-1 = one step from zero state.
    g_b = (jnp.dot(x[T - 1], wih_b, preferred_element_type=jnp.float32)
           + params["b_b"])
    i_b, _, gg_b, o_b = act4(g_b)
    h_b = o_b * jnp.tanh(i_b * gg_b)

    y = (jnp.dot(h.astype(bf), w_out[:H], preferred_element_type=jnp.float32)
         + jnp.dot(h_b.astype(bf), w_out[H:], preferred_element_type=jnp.float32)
         + params["b_out"])
    return jax.nn.log_softmax(y, axis=-1)


if __name__ == "__main__":
    # Small shapes consistent with the module's forward pass.
    T, B = 8, 4                 # sequence length, batch
    vocab_size = 50
    embedding_dim = 16
    hidden_dim = 32
    label_size = 4

    key = jax.random.PRNGKey(0)
    k_sent, k_par = jax.random.split(key)
    sentence = jax.random.randint(k_sent, (T, B), 0, vocab_size, dtype=jnp.int32)
    params = init_params(k_par, vocab_size, embedding_dim, hidden_dim, label_size)

    # time_chunk=4 -> grid of 2 time chunks, exercising the h/c carry scratch.
    log_probs = bilstm_sentiment_forward(
        sentence, params, hidden_dim=hidden_dim, label_size=label_size,
        time_chunk=4)
    log_probs = jax.block_until_ready(log_probs)

    ref = reference_forward(
        sentence, params, hidden_dim=hidden_dim, label_size=label_size)
    assert log_probs.shape == (B, label_size)
    assert jnp.allclose(log_probs, ref, atol=5e-3, rtol=5e-3), (
        "kernel output does not match reference")

    print("KERNEL_OK")
</pallas_src>

<mosaic_0001>
module attributes {stable_mosaic.version = 11 : i64} {
  func.func @_bilstm_kernel(%arg0: i32, %arg1: memref<64x16xbf16, #tpu.memory_space<vmem>>, %arg2: memref<16x128xbf16, #tpu.memory_space<vmem>>, %arg3: memref<32x128xbf16, #tpu.memory_space<vmem>>, %arg4: memref<1x128xf32, #tpu.memory_space<vmem>>, %arg5: memref<16x128xbf16, #tpu.memory_space<vmem>>, %arg6: memref<1x128xf32, #tpu.memory_space<vmem>>, %arg7: memref<64x4xbf16, #tpu.memory_space<vmem>>, %arg8: memref<1x4xf32, #tpu.memory_space<vmem>>, %arg9: memref<16x4xf32, #tpu.memory_space<vmem>>, %arg10: memref<64x128xbf16, #tpu.memory_space<vmem>>, %arg11: memref<16x32xf32, #tpu.memory_space<vmem>>, %arg12: memref<16x32xf32, #tpu.memory_space<vmem>>) attributes {dimension_semantics = [#tpu.dimension_semantics<arbitrary>], iteration_bounds = array<i64: 2>, scalar_prefetch = 0 : i64, scratch_operands = 3 : i64, tpu.core_type = #tpu.core_type<tc>, window_params = [{transform_indices = @transform_0, window_bounds = array<i64: 64, 16>}, {pipeline_mode = #tpu.pipeline_mode<synchronous>, transform_indices = @transform_1, window_bounds = array<i64: 16, 128>}, {pipeline_mode = #tpu.pipeline_mode<synchronous>, transform_indices = @transform_2, window_bounds = array<i64: 32, 128>}, {pipeline_mode = #tpu.pipeline_mode<synchronous>, transform_indices = @transform_3, window_bounds = array<i64: 1, 128>}, {pipeline_mode = #tpu.pipeline_mode<synchronous>, transform_indices = @transform_4, window_bounds = array<i64: 16, 128>}, {pipeline_mode = #tpu.pipeline_mode<synchronous>, transform_indices = @transform_5, window_bounds = array<i64: 1, 128>}, {pipeline_mode = #tpu.pipeline_mode<synchronous>, transform_indices = @transform_6, window_bounds = array<i64: 64, 4>}, {pipeline_mode = #tpu.pipeline_mode<synchronous>, transform_indices = @transform_7, window_bounds = array<i64: 1, 4>}, {pipeline_mode = #tpu.pipeline_mode<synchronous>, transform_indices = @transform_8, window_bounds = array<i64: 16, 4>}]} {
    %c0_i32 = arith.constant 0 : i32
    %0 = arith.cmpi eq, %arg0, %c0_i32 : i32
    %1 = arith.extui %0 : i1 to i32
    %c0_i32_0 = arith.constant 0 : i32
    %2 = arith.cmpi ne, %1, %c0_i32_0 : i32
    scf.if %2 {
      %cst_36 = arith.constant 0.000000e+00 : f32
      %127 = vector.broadcast %cst_36 : f32 to vector<16x32xf32>
      %c0_37 = arith.constant 0 : index
      %c0_38 = arith.constant 0 : index
      %128 = vector.load %arg11[%c0_37, %c0_38] : memref<16x32xf32, #tpu.memory_space<vmem>>, vector<16x32xf32>
      tpu.vector_store %arg11[%c0_37, %c0_38], %127 {strides = array<i32>} : memref<16x32xf32, #tpu.memory_space<vmem>>, vector<16x32xf32>,
      %cst_39 = arith.constant 0.000000e+00 : f32
      %129 = vector.broadcast %cst_39 : f32 to vector<16x32xf32>
      %c0_40 = arith.constant 0 : index
      %c0_41 = arith.constant 0 : index
      %130 = vector.load %arg12[%c0_40, %c0_41] : memref<16x32xf32, #tpu.memory_space<vmem>>, vector<16x32xf32>
      tpu.vector_store %arg12[%c0_40, %c0_41], %129 {strides = array<i32>} : memref<16x32xf32, #tpu.memory_space<vmem>>, vector<16x32xf32>,
    } else {
    }
    %3 = tpu.iota {dimensions = array<i32: 1>} : vector<1x128xi32>
    %c64_i32 = arith.constant 64 : i32
    %4 = vector.broadcast %c64_i32 : i32 to vector<1x128xi32>
    %5 = arith.cmpi sge, %3, %4 : vector<1x128xi32>
    %c96_i32 = arith.constant 96 : i32
    %6 = vector.broadcast %c96_i32 : i32 to vector<1x128xi32>
    %7 = arith.cmpi slt, %3, %6 : vector<1x128xi32>
    %8 = arith.andi %5, %7 : vector<1x128xi1>
    %cst = arith.constant 1.000000e+00 : f32
    %cst_1 = arith.constant 5.000000e-01 : f32
    %9 = vector.broadcast %cst : f32 to vector<1x128xf32>
    %10 = vector.broadcast %cst_1 : f32 to vector<1x128xf32>
    %11 = arith.select %8, %9, %10 : vector<1x128xi1>, vector<1x128xf32>
    %cst_2 = arith.constant 0.000000e+00 : f32
    %cst_3 = arith.constant 5.000000e-01 : f32
    %12 = vector.broadcast %cst_2 : f32 to vector<1x128xf32>
    %13 = vector.broadcast %cst_3 : f32 to vector<1x128xf32>
    %14 = arith.select %8, %12, %13 : vector<1x128xi1>, vector<1x128xf32>
    %c0 = arith.constant 0 : index
    %c0_4 = arith.constant 0 : index
    %15 = vector.load %arg1[%c0, %c0_4] : memref<64x16xbf16, #tpu.memory_space<vmem>>, vector<64x16xbf16>
    %c0_5 = arith.constant 0 : index
    %c0_6 = arith.constant 0 : index
    %16 = vector.load %arg2[%c0_5, %c0_6] : memref<16x128xbf16, #tpu.memory_space<vmem>>, vector<16x128xbf16>
    %cst_7 = arith.constant dense<0.000000e+00> : vector<64x128xf32>
    %17 = tpu.matmul %15, %16, %cst_7 {dimension_numbers = #tpu.dot_dimension_numbers<[1], [0], [0], [1], [0, 0, 1, 1], [], []>} : vector<64x16xbf16>, vector<16x128xbf16>, vector<64x128xf32> -> vector<64x128xf32>
    %c0_8 = arith.constant 0 : index
    %c0_9 = arith.constant 0 : index
    %18 = vector.load %arg4[%c0_8, %c0_9] : memref<1x128xf32, #tpu.memory_space<vmem>>, vector<1x128xf32>
    %19 = vector.broadcast %18 : vector<1x128xf32> to vector<64x128xf32>
    %20 = arith.addf %17, %19 : vector<64x128xf32>
    %21 = arith.truncf %20 : vector<64x128xf32> to vector<64x128xbf16>
    %c0_10 = arith.constant 0 : index
    %c0_11 = arith.constant 0 : index
    %22 = vector.load %arg10[%c0_10, %c0_11] : memref<64x128xbf16, #tpu.memory_space<vmem>>, vector<64x128xbf16>
    tpu.vector_store %arg10[%c0_10, %c0_11], %21 {strides = array<i32>} : memref<64x128xbf16, #tpu.memory_space<vmem>>, vector<64x128xbf16>,
    %c0_12 = arith.constant 0 : index
    %c0_13 = arith.constant 0 : index
    %23 = vector.load %arg3[%c0_12, %c0_13] : memref<32x128xbf16, #tpu.memory_space<vmem>>, vector<32x128xbf16>
    %c0_14 = arith.constant 0 : index
    %c0_15 = arith.constant 0 : index
    %24 = vector.load %arg11[%c0_14, %c0_15] : memref<16x32xf32, #tpu.memory_space<vmem>>, vector<16x32xf32>
    %c0_16 = arith.constant 0 : index
    %c0_17 = arith.constant 0 : index
    %25 = vector.load %arg12[%c0_16, %c0_17] : memref<16x32xf32, #tpu.memory_space<vmem>>, vector<16x32xf32>
    %c0_i32_18 = arith.constant 0 : i32
    %c16_i32 = arith.constant 16 : i32
    %26 = arith.muli %c0_i32_18, %c16_i32 : i32
    %27 = tpu.assume_multiple %26, 16 : i32
    %28 = arith.index_cast %27 : i32 to index
    %c0_19 = arith.constant 0 : index
    %29 = vector.load %arg10[%28, %c0_19] : memref<64x128xbf16, #tpu.memory_space<vmem>>, vector<16x128xbf16>
    %30 = arith.extf %29 : vector<16x128xbf16> to vector<16x128xf32>
    %31 = arith.truncf %24 : vector<16x32xf32> to vector<16x32xbf16>
    %cst_20 = arith.constant dense<0.000000e+00> : vector<16x128xf32>
    %32 = tpu.matmul %31, %23, %cst_20 {dimension_numbers = #tpu.dot_dimension_numbers<[1], [0], [0], [1], [0, 0, 1, 1], [], []>} : vector<16x32xbf16>, vector<32x128xbf16>, vector<16x128xf32> -> vector<16x128xf32>
    %33 = arith.addf %30, %32 : vector<16x128xf32>
    %34 = vector.broadcast %11 : vector<1x128xf32> to vector<16x128xf32>
    %35 = arith.mulf %34, %33 : vector<16x128xf32>
    %36 = math.tanh %35 : vector<16x128xf32>
    %37 = vector.broadcast %11 : vector<1x128xf32> to vector<16x128xf32>
    %38 = arith.mulf %37, %36 : vector<16x128xf32>
    %39 = vector.broadcast %14 : vector<1x128xf32> to vector<16x128xf32>
    %40 = arith.addf %38, %39 : vector<16x128xf32>
    %41 = vector.extract_strided_slice %40 {offsets = [0, 0], sizes = [16, 32], strides = [1, 1]} : vector<16x128xf32> to vector<16x32xf32>
    %42 = vector.extract_strided_slice %40 {offsets = [0, 32], sizes = [16, 32], strides = [1, 1]} : vector<16x128xf32> to vector<16x32xf32>
    %43 = vector.extract_strided_slice %40 {offsets = [0, 64], sizes = [16, 32], strides = [1, 1]} : vector<16x128xf32> to vector<16x32xf32>
    %44 = vector.extract_strided_slice %40 {offsets = [0, 96], sizes = [16, 32], strides = [1, 1]} : vector<16x128xf32> to vector<16x32xf32>
    %45 = arith.mulf %42, %25 : vector<16x32xf32>
    %46 = arith.mulf %41, %43 : vector<16x32xf32>
    %47 = arith.addf %45, %46 : vector<16x32xf32>
    %48 = math.tanh %47 : vector<16x32xf32>
    %49 = arith.mulf %44, %48 : vector<16x32xf32>
    %c1_i32 = arith.constant 1 : i32
    %c16_i32_21 = arith.constant 16 : i32
    %50 = arith.muli %c1_i32, %c16_i32_21 : i32
    %51 = tpu.assume_multiple %50, 16 : i32
    %52 = arith.index_cast %51 : i32 to index
    %c0_22 = arith.constant 0 : index
    %53 = vector.load %arg10[%52, %c0_22] : memref<64x128xbf16, #tpu.memory_space<vmem>>, vector<16x128xbf16>
    %54 = arith.extf %53 : vector<16x128xbf16> to vector<16x128xf32>
    %55 = arith.truncf %49 : vector<16x32xf32> to vector<16x32xbf16>
    %cst_23 = arith.constant dense<0.000000e+00> : vector<16x128xf32>
    %56 = tpu.matmul %55, %23, %cst_23 {dimension_numbers = #tpu.dot_dimension_numbers<[1], [0], [0], [1], [0, 0, 1, 1], [], []>} : vector<16x32xbf16>, vector<32x128xbf16>, vector<16x128xf32> -> vector<16x128xf32>
    %57 = arith.addf %54, %56 : vector<16x128xf32>
    %58 = vector.broadcast %11 : vector<1x128xf32> to vector<16x128xf32>
    %59 = arith.mulf %58, %57 : vector<16x128xf32>
    %60 = math.tanh %59 : vector<16x128xf32>
    %61 = vector.broadcast %11 : vector<1x128xf32> to vector<16x128xf32>
    %62 = arith.mulf %61, %60 : vector<16x128xf32>
    %63 = vector.broadcast %14 : vector<1x128xf32> to vector<16x128xf32>
    %64 = arith.addf %62, %63 : vector<16x128xf32>
    %65 = vector.extract_strided_slice %64 {offsets = [0, 0], sizes = [16, 32], strides = [1, 1]} : vector<16x128xf32> to vector<16x32xf32>
    %66 = vector.extract_strided_slice %64 {offsets = [0, 32], sizes = [16, 32], strides = [1, 1]} : vector<16x128xf32> to vector<16x32xf32>
    %67 = vector.extract_strided_slice %64 {offsets = [0, 64], sizes = [16, 32], strides = [1, 1]} : vector<16x128xf32> to vector<16x32xf32>
    %68 = vector.extract_strided_slice %64 {offsets = [0, 96], sizes = [16, 32], strides = [1, 1]} : vector<16x128xf32> to vector<16x32xf32>
    %69 = arith.mulf %66, %47 : vector<16x32xf32>
    %70 = arith.mulf %65, %67 : vector<16x32xf32>
    %71 = arith.addf %69, %70 : vector<16x32xf32>
    %72 = math.tanh %71 : vector<16x32xf32>
    %73 = arith.mulf %68, %72 : vector<16x32xf32>
    %c2_i32 = arith.constant 2 : i32
    %c16_i32_24 = arith.constant 16 : i32
    %74 = arith.muli %c2_i32, %c16_i32_24 : i32
    %75 = tpu.assume_multiple %74, 16 : i32
    %76 = arith.index_cast %75 : i32 to index
    %c0_25 = arith.constant 0 : index
    %77 = vector.load %arg10[%76, %c0_25] : memref<64x128xbf16, #tpu.memory_space<vmem>>, vector<16x128xbf16>
    %78 = arith.extf %77 : vector<16x128xbf16> to vector<16x128xf32>
    %79 = arith.truncf %73 : vector<16x32xf32> to vector<16x32xbf16>
    %cst_26 = arith.constant dense<0.000000e+00> : vector<16x128xf32>
    %80 = tpu.matmul %79, %23, %cst_26 {dimension_numbers = #tpu.dot_dimension_numbers<[1], [0], [0], [1], [0, 0, 1, 1], [], []>} : vector<16x32xbf16>, vector<32x128xbf16>, vector<16x128xf32> -> vector<16x128xf32>
    %81 = arith.addf %78, %80 : vector<16x128xf32>
    %82 = vector.broadcast %11 : vector<1x128xf32> to vector<16x128xf32>
    %83 = arith.mulf %82, %81 : vector<16x128xf32>
    %84 = math.tanh %83 : vector<16x128xf32>
    %85 = vector.broadcast %11 : vector<1x128xf32> to vector<16x128xf32>
    %86 = arith.mulf %85, %84 : vector<16x128xf32>
    %87 = vector.broadcast %14 : vector<1x128xf32> to vector<16x128xf32>
    %88 = arith.addf %86, %87 : vector<16x128xf32>
    %89 = vector.extract_strided_slice %88 {offsets = [0, 0], sizes = [16, 32], strides = [1, 1]} : vector<16x128xf32> to vector<16x32xf32>
    %90 = vector.extract_strided_slice %88 {offsets = [0, 32], sizes = [16, 32], strides = [1, 1]} : vector<16x128xf32> to vector<16x32xf32>
    %91 = vector.extract_strided_slice %88 {offsets = [0, 64], sizes = [16, 32], strides = [1, 1]} : vector<16x128xf32> to vector<16x32xf32>
    %92 = vector.extract_strided_slice %88 {offsets = [0, 96], sizes = [16, 32], strides = [1, 1]} : vector<16x128xf32> to vector<16x32xf32>
    %93 = arith.mulf %90, %71 : vector<16x32xf32>
    %94 = arith.mulf %89, %91 : vector<16x32xf32>
    %95 = arith.addf %93, %94 : vector<16x32xf32>
    %96 = math.tanh %95 : vector<16x32xf32>
    %97 = arith.mulf %92, %96 : vector<16x32xf32>
    %c3_i32 = arith.constant 3 : i32
    %c16_i32_27 = arith.constant 16 : i32
    %98 = arith.muli %c3_i32, %c16_i32_27 : i32
    %99 = tpu.assume_multiple %98, 16 : i32
    %100 = arith.index_cast %99 : i32 to index
    %c0_28 = arith.constant 0 : index
    %101 = vector.load %arg10[%100, %c0_28] : memref<64x128xbf16, #tpu.memory_space<vmem>>, vector<16x128xbf16>
    %102 = arith.extf %101 : vector<16x128xbf16> to vector<16x128xf32>
    %103 = arith.truncf %97 : vector<16x32xf32> to vector<16x32xbf16>
    %cst_29 = arith.constant dense<0.000000e+00> : vector<16x128xf32>
    %104 = tpu.matmul %103, %23, %cst_29 {dimension_numbers = #tpu.dot_dimension_numbers<[1], [0], [0], [1], [0, 0, 1, 1], [], []>} : vector<16x32xbf16>, vector<32x128xbf16>, vector<16x128xf32> -> vector<16x128xf32>
    %105 = arith.addf %102, %104 : vector<16x128xf32>
    %106 = vector.broadcast %11 : vector<1x128xf32> to vector<16x128xf32>
    %107 = arith.mulf %106, %105 : vector<16x128xf32>
    %108 = math.tanh %107 : vector<16x128xf32>
    %109 = vector.broadcast %11 : vector<1x128xf32> to vector<16x128xf32>
    %110 = arith.mulf %109, %108 : vector<16x128xf32>
    %111 = vector.broadcast %14 : vector<1x128xf32> to vector<16x128xf32>
    %112 = arith.addf %110, %111 : vector<16x128xf32>
    %113 = vector.extract_strided_slice %112 {offsets = [0, 0], sizes = [16, 32], strides = [1, 1]} : vector<16x128xf32> to vector<16x32xf32>
    %114 = vector.extract_strided_slice %112 {offsets = [0, 32], sizes = [16, 32], strides = [1, 1]} : vector<16x128xf32> to vector<16x32xf32>
    %115 = vector.extract_strided_slice %112 {offsets = [0, 64], sizes = [16, 32], strides = [1, 1]} : vector<16x128xf32> to vector<16x32xf32>
    %116 = vector.extract_strided_slice %112 {offsets = [0, 96], sizes = [16, 32], strides = [1, 1]} : vector<16x128xf32> to vector<16x32xf32>
    %117 = arith.mulf %114, %95 : vector<16x32xf32>
    %118 = arith.mulf %113, %115 : vector<16x32xf32>
    %119 = arith.addf %117, %118 : vector<16x32xf32>
    %120 = math.tanh %119 : vector<16x32xf32>
    %121 = arith.mulf %116, %120 : vector<16x32xf32>
    %c4_i32 = arith.constant 4 : i32
    %c0_30 = arith.constant 0 : index
    %c0_31 = arith.constant 0 : index
    %122 = vector.load %arg11[%c0_30, %c0_31] : memref<16x32xf32, #tpu.memory_space<vmem>>, vector<16x32xf32>
    tpu.vector_store %arg11[%c0_30, %c0_31], %121 {strides = array<i32>} : memref<16x32xf32, #tpu.memory_space<vmem>>, vector<16x32xf32>,
    %c0_32 = arith.constant 0 : index
    %c0_33 = arith.constant 0 : index
    %123 = vector.load %arg12[%c0_32, %c0_33] : memref<16x32xf32, #tpu.memory_space<vmem>>, vector<16x32xf32>
    tpu.vector_store %arg12[%c0_32, %c0_33], %119 {strides = array<i32>} : memref<16x32xf32, #tpu.memory_space<vmem>>, vector<16x32xf32>,
    %c1_i32_34 = arith.constant 1 : i32
    %124 = arith.cmpi eq, %arg0, %c1_i32_34 : i32
    %125 = arith.extui %124 : i1 to i32
    %c0_i32_35 = arith.constant 0 : i32
    %126 = arith.cmpi ne, %125, %c0_i32_35 : i32
    scf.if %126 {
      %c48 = arith.constant 48 : index
      %c0_36 = arith.constant 0 : index
      %127 = vector.load %arg1[%c48, %c0_36] : memref<64x16xbf16, #tpu.memory_space<vmem>>, vector<16x16xbf16>
      %c0_37 = arith.constant 0 : index
      %c0_38 = arith.constant 0 : index
      %128 = vector.load %arg5[%c0_37, %c0_38] : memref<16x128xbf16, #tpu.memory_space<vmem>>, vector<16x128xbf16>
      %cst_39 = arith.constant dense<0.000000e+00> : vector<16x128xf32>
      %129 = tpu.matmul %127, %128, %cst_39 {dimension_numbers = #tpu.dot_dimension_numbers<[1], [0], [0], [1], [0, 0, 1, 1], [], []>} : vector<16x16xbf16>, vector<16x128xbf16>, vector<16x128xf32> -> vector<16x128xf32>
      %c0_40 = arith.constant 0 : index
      %c0_41 = arith.constant 0 : index
      %130 = vector.load %arg6[%c0_40, %c0_41] : memref<1x128xf32, #tpu.memory_space<vmem>>, vector<1x128xf32>
      %131 = vector.broadcast %130 : vector<1x128xf32> to vector<16x128xf32>
      %132 = arith.addf %129, %131 : vector<16x128xf32>
      %133 = vector.broadcast %11 : vector<1x128xf32> to vector<16x128xf32>
      %134 = arith.mulf %133, %132 : vector<16x128xf32>
      %135 = math.tanh %134 : vector<16x128xf32>
      %136 = vector.broadcast %11 : vector<1x128xf32> to vector<16x128xf32>
      %137 = arith.mulf %136, %135 : vector<16x128xf32>
      %138 = vector.broadcast %14 : vector<1x128xf32> to vector<16x128xf32>
      %139 = arith.addf %137, %138 : vector<16x128xf32>
      %140 = vector.extract_strided_slice %139 {offsets = [0, 0], sizes = [16, 32], strides = [1, 1]} : vector<16x128xf32> to vector<16x32xf32>
      %141 = vector.extract_strided_slice %139 {offsets = [0, 64], sizes = [16, 32], strides = [1, 1]} : vector<16x128xf32> to vector<16x32xf32>
      %142 = vector.extract_strided_slice %139 {offsets = [0, 96], sizes = [16, 32], strides = [1, 1]} : vector<16x128xf32> to vector<16x32xf32>
      %143 = arith.mulf %140, %141 : vector<16x32xf32>
      %144 = math.tanh %143 : vector<16x32xf32>
      %145 = arith.mulf %142, %144 : vector<16x32xf32>
      %c0_42 = arith.constant 0 : index
      %c0_43 = arith.constant 0 : index
      %146 = vector.load %arg7[%c0_42, %c0_43] : memref<64x4xbf16, #tpu.memory_space<vmem>>, vector<32x4xbf16>
      %c32 = arith.constant 32 : index
      %c0_44 = arith.constant 0 : index
      %147 = vector.load %arg7[%c32, %c0_44] : memref<64x4xbf16, #tpu.memory_space<vmem>>, vector<32x4xbf16>
      %148 = arith.truncf %121 : vector<16x32xf32> to vector<16x32xbf16>
      %cst_45 = arith.constant dense<0.000000e+00> : vector<16x4xf32>
      %149 = tpu.matmul %148, %146, %cst_45 {dimension_numbers = #tpu.dot_dimension_numbers<[1], [0], [0], [1], [0, 0, 1, 1], [], []>} : vector<16x32xbf16>, vector<32x4xbf16>, vector<16x4xf32> -> vector<16x4xf32>
      %150 = arith.truncf %145 : vector<16x32xf32> to vector<16x32xbf16>
      %cst_46 = arith.constant dense<0.000000e+00> : vector<16x4xf32>
      %151 = tpu.matmul %150, %147, %cst_46 {dimension_numbers = #tpu.dot_dimension_numbers<[1], [0], [0], [1], [0, 0, 1, 1], [], []>} : vector<16x32xbf16>, vector<32x4xbf16>, vector<16x4xf32> -> vector<16x4xf32>
      %152 = arith.addf %149, %151 : vector<16x4xf32>
      %c0_47 = arith.constant 0 : index
      %c0_48 = arith.constant 0 : index
      %153 = vector.load %arg8[%c0_47, %c0_48] : memref<1x4xf32, #tpu.memory_space<vmem>>, vector<1x4xf32>
      %154 = vector.broadcast %153 : vector<1x4xf32> to vector<16x4xf32>
      %155 = arith.addf %152, %154 : vector<16x4xf32>
      %cst_49 = arith.constant dense<0xFF800000> : vector<16xf32>
      %156 = vector.multi_reduction <maximumf>, %155, %cst_49 [1] : vector<16x4xf32> to vector<16xf32>
      %157 = vector.shape_cast %156 : vector<16xf32> to vector<16x1xf32>
      %158 = vector.broadcast %157 : vector<16x1xf32> to vector<16x4xf32>
      %159 = arith.subf %155, %158 : vector<16x4xf32>
      %160 = math.exp %159 : vector<16x4xf32>
      %cst_50 = arith.constant dense<0.000000e+00> : vector<16xf32>
      %161 = vector.multi_reduction <add>, %160, %cst_50 [1] : vector<16x4xf32> to vector<16xf32>
      %162 = vector.shape_cast %161 : vector<16xf32> to vector<16x1xf32>
      %163 = math.log %162 : vector<16x1xf32>
      %164 = vector.broadcast %163 : vector<16x1xf32> to vector<16x4xf32>
      %165 = arith.subf %159, %164 : vector<16x4xf32>
      %c0_51 = arith.constant 0 : index
      %c0_52 = arith.constant 0 : index
      %166 = vector.load %arg9[%c0_51, %c0_52] : memref<16x4xf32, #tpu.memory_space<vmem>>, vector<16x4xf32>
      tpu.vector_store %arg9[%c0_51, %c0_52], %165 {strides = array<i32>} : memref<16x4xf32, #tpu.memory_space<vmem>>, vector<16x4xf32>,
    } else {
    }
    return
  }
  func.func @transform_0(%arg0: i32) -> (i32, i32) {
    %c0_i32 = arith.constant 0 : i32
    %c0_i32_0 = arith.constant 0 : i32
    return %arg0, %c0_i32 : i32, i32
  }
  func.func @transform_1(%arg0: i32) -> (i32, i32) {
    %c0_i32 = arith.constant 0 : i32
    %c0_i32_0 = arith.constant 0 : i32
    %c0_i32_1 = arith.constant 0 : i32
    return %c0_i32, %c0_i32_0 : i32, i32
  }
  func.func @transform_2(%arg0: i32) -> (i32, i32) {
    %c0_i32 = arith.constant 0 : i32
    %c0_i32_0 = arith.constant 0 : i32
    %c0_i32_1 = arith.constant 0 : i32
    return %c0_i32, %c0_i32_0 : i32, i32
  }
  func.func @transform_3(%arg0: i32) -> (i32, i32) {
    %c0_i32 = arith.constant 0 : i32
    %c0_i32_0 = arith.constant 0 : i32
    %c0_i32_1 = arith.constant 0 : i32
    return %c0_i32, %c0_i32_0 : i32, i32
  }
  func.func @transform_4(%arg0: i32) -> (i32, i32) {
    %c0_i32 = arith.constant 0 : i32
    %c0_i32_0 = arith.constant 0 : i32
    %c0_i32_1 = arith.constant 0 : i32
    return %c0_i32, %c0_i32_0 : i32, i32
  }
  func.func @transform_5(%arg0: i32) -> (i32, i32) {
    %c0_i32 = arith.constant 0 : i32
    %c0_i32_0 = arith.constant 0 : i32
    %c0_i32_1 = arith.constant 0 : i32
    return %c0_i32, %c0_i32_0 : i32, i32
  }
  func.func @transform_6(%arg0: i32) -> (i32, i32) {
    %c0_i32 = arith.constant 0 : i32
    %c0_i32_0 = arith.constant 0 : i32
    %c0_i32_1 = arith.constant 0 : i32
    return %c0_i32, %c0_i32_0 : i32, i32
  }
  func.func @transform_7(%arg0: i32) -> (i32, i32) {
    %c0_i32 = arith.constant 0 : i32
    %c0_i32_0 = arith.constant 0 : i32
    %c0_i32_1 = arith.constant 0 : i32
    return %c0_i32, %c0_i32_0 : i32, i32
  }
  func.func @transform_8(%arg0: i32) -> (i32, i32) {
    %c0_i32 = arith.constant 0 : i32
    %c0_i32_0 = arith.constant 0 : i32
    %c0_i32_1 = arith.constant 0 : i32
    return %c0_i32, %c0_i32_0 : i32, i32
  }
}

</mosaic_0001>

<bundles_post_ra>
// kernel: tpu_custom_call.1
= control target key start
LH: loop header
LB: loop body
LE: loop exit
PB: predicated region body
PF: predicated region fallthrough
CT: control target
= control target key end

     0   :  { %s1432_s27 = smov 0   ;;  %s1633_s0 = inlined_call_operand.vmem [shape: bf16[128,16], index: 0, kind: input, shape index: {}]   ;;  %s1634_s1 = inlined_call_operand.vmem [shape: bf16[16,128], index: 1, kind: input, shape index: {}]   ;;  %s1635_s2 = inlined_call_operand.vmem [shape: bf16[32,128], index: 2, kind: input, shape index: {}]   ;;  %s1636_s3 = inlined_call_operand.vmem [shape: f32[1,128], index: 3, kind: input, shape index: {}]   ;;  %s1637_s4 = inlined_call_operand.vmem [shape: bf16[16,128], index: 4, kind: input, shape index: {}]   ;;  %s1638_s5 = inlined_call_operand.vmem [shape: f32[1,128], index: 5, kind: input, shape index: {}]   ;;  %s1639_s6 = inlined_call_operand.vmem [shape: bf16[64,4], index: 6, kind: input, shape index: {}]   ;;  %s1640_s7 = inlined_call_operand.vmem [shape: f32[1,4], index: 7, kind: input, shape index: {}]   ;;  %s1641_s8 = inlined_call_operand.vmem [shape: f32[16,4], index: 8, kind: output, shape index: {}]  }
   0x1 LB: > { %s1438_s28 = sadd.s32 4294967295, %s1373_s27   ;;  %p1163_p0 = scmp.ge.s32.totalorder %s1373_s27, 1  ;;  %s1373_s27 = sphi %s1432_s27, %s18_s27  }
   0x2   : > { %p258_p1 = scmp.lt.s32.totalorder %s1373_s27, 3 }
   0x4   : > { %p259_p2 = pnand %p1163_p0, %p258_p1 }
   0x5   : > { %s1164_s29 = sshll.u32 (!%p259_p2), %s1438_s28, 3  ;;  %p1166_p4 = scmp.ne.s32.totalorder (!%p259_p2), %s1438_s28, 0 }
   0x6   : > { %262 = sbr.rel (%p259_p2) target bundleno = 3678 (0xe5e), region = 52  ;;  %p288_p3 = scmp.lt.s32.totalorder (!%p259_p2), %s1164_s29, 15 }
   0xd   : > { %s1643_s29 = smov (!%p288_p3, %s1164_s29), 15  ;;  %297 = sbr.rel (%p1166_p4) target bundleno = 20 (0x14), region = 56 }
   0xe   : > { %s1165_s30 = sshll.u32 %s1643_s29, 2  ;;  %vm298_vm0 = vcmask (!%p1166_p4), 261120   ;;  %v1375_v0 = vmov (!%p1166_p4), 0.0  }
   0xf   : > { %s1446_s11 = scalar_lea.vmem %s1633_s0, %s1165_s30  ;;  %299 = vst.msk [vmem:[#allocation3] sm:$0xff] (!%p1166_p4), %vm298_vm0, %v1375_v0  ;;  %300 = vst.msk [vmem:[#allocation3 + $0x8] sm:$0xff] (!%p1166_p4), %vm298_vm0, %v1375_v0 }
  0x10   : > { %301 = vst.msk [vmem:[#allocation4] sm:$0xff] (!%p1166_p4), %vm298_vm0, %v1375_v0  ;;  %302 = vst.msk [vmem:[#allocation4 + $0x8] sm:$0xff] (!%p1166_p4), %vm298_vm0, %v1375_v0 }
  0x14 PF: > { %v1306_v1 = vld [vmem:[%s1634_s1] sm:$0xff]   ;;  %v1376_v2 = vmov 0.0   ;;  %vm353_vm1 = vcmask 130048   ;;  %v1309_v5 = vld [vmem:[%s1446_s11 + $0x8] sm:$0xff]   ;;  %vm1377_vm2 = vmmov 0   ;;  %s1378_s18 = smov 32   ;;  %v303_v12 = vlaneseq }
  0x15   : > { %1232 = vmatprep.subr.bf16.mxu1 %v1376_v2  ;;  %v1307_v3 = vld [vmem:[%s1446_s11] sm:$0xff]   ;;  %1222 = vmatprep.subr.bf16.mxu0 %v1306_v1  ;;  %v1465_v6 = vld [vmem:[%s1635_s2 + $0x8] sm:$0xff]   ;;  %vm463_vm3 = vcmask 261120   ;;  %v1379_v31 = vmov 0.5   ;;  %s1380_s21 = smov 64   ;;  %s1381_s22 = smov 96  }
  0x16   : > { %v1457_v4 = vld [vmem:[%s1635_s2] sm:$0xff]   ;;  %1223 = vmatpush3.bf16.msra.mxu0 %v1306_v1  ;;  %1224 = vmatprep.mubr.msk.bf16.mxu0 %vm353_vm1, %v1307_v3  ;;  %v444_v8 = vld [vmem:[#allocation3 + $0x8] sm:$0xff]  ;;  %v304_v13 = vand.u32 127, %v303_v12  ;;  %p1183_p5 = scmp.ne.s32.totalorder %s1438_s28, 1 }
  0x17   : > { %1233 = vmatpush3.bf16.msra.mxu1 %v1457_v4  ;;  %1236 = vmatprep.mubr.msk.bf16.mxu1 %vm1377_vm2, %v1376_v2  ;;  %v443_v7 = vld [vmem:[#allocation3] sm:$0xff]  ;;  %v445_v9 = vld [vmem:[#allocation4] sm:$0xff]  ;;  %v446_v11 = vld [vmem:[#allocation4 + $0x8] sm:$0xff]  ;;  %vm1383_vm7 = vmmov (!%p1183_p5), 0   ;;  %s1384_s28 = smov (!%p1183_p5), 64   ;;  %s1385_s15 = smov (!%p1183_p5), 96  }
  0x18   : > { %1234 = vmatprep.subr.bf16.mxu1 %v1376_v2  ;;  %1248 = vmatprep.subr.bf16.mxu0 %v1376_v2  ;;  %v450_v10 = vpack.c.bf16 %v444_v8, %v443_v7  ;;  %v1489_v15 = vld [vmem:[%s1636_s3] ss:$0 sm:$0xff]  ;;  %vm305_vm4 = vcmp.ge.s32.totalorder %v304_v13, 64  ;;  %vm306_vm5 = vcmp.lt.s32.totalorder %v304_v13, 96  ;;  %s1386_s16 = smov (!%p1183_p5), 32   ;;  %vm1105_vm8 = vcmask (!%p1183_p5), 31744  }
  0x19   : > { %1225 = vmatmul.mubr.msk.bf16.vlgmr.msra.gmra.mrb[0].mxu0 %vm353_vm1, %v1309_v5  ;;  %520 = vrot.lane.b32.xlu1 %v445_v9, %s1378_s18  ;;  %vm307_vm6 = vmand %vm305_vm4, %vm306_vm5 }
  0x1a   : > { %1249 = vmatpush3.bf16.msra.mxu0 %v1457_v4  ;;  %v1497_v32 = vsel %vm307_vm6, 1.0, %v1379_v31  ;;  %v1501_v38 = vsel %vm307_vm6, 0.0, %v1379_v31 }
  0x1b   : > { %1235 = vmatpush3.bf16.msra.mxu1 %v1465_v6  ;;  %1250 = vmatprep.subr.bf16.mxu0 %v1376_v2 }
  0x1c   : > { %1240 = vmatprep.subr.bf16.mxu1 %v1376_v2 }
  0x1d   : > { %522 = vrot.lane.b32.xlu1 %v446_v11, %s1378_s18 }
  0x1e   : > { %1237 = vmatmul.mubr.msk.bf16.vlgmr.msra.gmra.mrb[0].mxu1 %vm463_vm3, %v450_v10  ;;  %1251 = vmatpush3.bf16.msra.mxu0 %v1465_v6 }
  0x1f   : > { %1241 = vmatpush3.bf16.msra.mxu1 %v1457_v4  ;;  %1244 = vmatprep.mubr.msk.bf16.mxu1 %vm1377_vm2, %v1376_v2 }
  0x20   : > { %1242 = vmatprep.subr.bf16.mxu1 %v1376_v2 }
  0x23   : > { %1243 = vmatpush3.bf16.msra.mxu1 %v1465_v6 }
  0x24   : > { %1256 = vmatprep.subr.bf16.mxu1 %v1376_v2 }
  0x8b   : > { %v521_v48 = vpop.permute.xlu1 %520 }
  0x8f   : > { %v523_v50 = vpop.permute.xlu1 %522 }
  0xec   : > { %v1226_v14 = vpop.f32.mrb[0].mxu0 }
  0xed   : > { %v400_v16 = vpop.f32.mrb[1].mxu0  ;;  %v409_v18 = vadd.f32 %v1226_v14, %v1489_v15 }
  0xee   : > { %v1227_v17 = vpop.f32.mrb[2].mxu0  ;;  %v401_v21 = vadd.f32 %v1489_v15, %v400_v16 }
  0xef   : > { %v412_v19 = vadd.f32 %v1227_v17, %v1489_v15  ;;  %v403_v20 = vpop.f32.mrb[3].mxu0 }
  0xf0   : > { %v404_v22 = vadd.f32 %v1489_v15, %v403_v20 }
  0xf1   : > { %v1495_v23 = vpack.c.bf16 %v412_v19, %v409_v18  ;;  %v501_v24 = vpop.f32.mrb[0].mxu1 }
  0xf2   : > { %v431_v25 = vpack.c.bf16 %v404_v22, %v401_v21  ;;  %v1238_v26 = vpop.f32.mrb[1].mxu1 }
  0xf3   : > { %v504_v27 = vpop.f32.mrb[2].mxu1  ;;  %v562_v0 = vunpack.c.l.bf16 %v1495_v23  ;;  %v563_v7 = vunpack.c.h.bf16 %v1495_v23 }
  0xf4   : > { %v448_v28 = vunpack.c.l.bf16 %v431_v25  ;;  %v449_v29 = vunpack.c.h.bf16 %v431_v25  ;;  %v1239_v30 = vpop.f32.mrb[3].mxu1 }
  0xf6   : > { %v508_v33 = vadd.f32 %v501_v24, %v448_v28  ;;  %v509_v34 = vadd.f32 %v504_v27, %v449_v29  ;;  %v1311_v28 = vld [vmem:[%s1446_s11 + $0x10] sm:$0xff]   ;;  %v1312_v29 = vld [vmem:[%s1446_s11 + $0x18] sm:$0xff]  }
  0xf7   : > { %1228 = vmatprep.mubr.msk.bf16.mxu0 %vm353_vm1, %v1311_v28 }
  0xf8   : > { %v510_v35 = vmul.f32 %v508_v33, %v1497_v32  ;;  %v511_v36 = vmul.f32 %v509_v34, %v1497_v32  ;;  %1229 = vmatmul.mubr.msk.bf16.gmra.mrb[4].mxu0 %vm353_vm1, %v1312_v29 }
  0xf9   : > { %1252 = vmatprep.mubr.msk.bf16.mxu0 %vm1377_vm2, %v1376_v2 }
  0xfa   : > { %1313 = vtanh.f32 %v510_v35 }
  0xfb   : > { %1315 = vtanh.f32 %v511_v36 }
 0x104   : > { %v1314_v37 = vpop.eup %1313 }
 0x105   : > { %v1316_v39 = vpop.eup %1315  ;;  %v514_v40 = vmul.f32 %v1314_v37, %v1497_v32 }
 0x106   : > { %v515_v42 = vmul.f32 %v1316_v39, %v1497_v32 }
 0x107   : > { %v516_v41 = vadd.f32 %v514_v40, %v1501_v38 }
 0x108   : > { %v517_v43 = vadd.f32 %v515_v42, %v1501_v38 }
 0x109   : > { %530 = vrot.lane.b32.xlu0 %v516_v41, %s1380_s21  ;;  %v526_v49 = vmul.f32 %v521_v48, %v516_v41 }
 0x10a   : > { %v527_v53 = vmul.f32 %v523_v50, %v517_v43 }
 0x10d   : > { %532 = vrot.lane.b32.xlu0 %v517_v43, %s1380_s21 }
 0x17b   : > { %v531_v44 = vpop.permute.xlu0 %530 }
 0x17c   : > { %v536_v45 = vmul.f32 %v531_v44, %v516_v41 }
 0x17e   : > { %540 = vrot.lane.b32.xlu0 %v536_v45, %s1378_s18 }
 0x17f   : > { %v533_v46 = vpop.permute.xlu0 %532 }
 0x180   : > { %v537_v47 = vmul.f32 %v533_v46, %v517_v43 }
 0x182   : > { %542 = vrot.lane.b32.xlu1 %v537_v47, %s1378_s18 }
 0x1cb   : > { %v1230_v39 = vpop.f32.mrb[4].mxu0 }
 0x1cc   : > { %v425_v40 = vadd.f32 %v1230_v39, %v1489_v15 }
 0x1f0   : > { %v541_v51 = vpop.permute.xlu0 %540 }
 0x1f1   : > { %v546_v52 = vadd.f32 %v541_v51, %v526_v49 }
 0x1f3   : > { %1317 = vtanh.f32 %v546_v52 }
 0x1f4   : > { %v543_v54 = vpop.permute.xlu1 %542 }
 0x1f5   : > { %v547_v55 = vadd.f32 %v543_v54, %v527_v53 }
 0x1f7   : > { %1319 = vtanh.f32 %v547_v55 }
 0x1fd   : > { %v1318_v56 = vpop.eup %1317 }
 0x1fe   : > { %552 = vrot.lane.b32.xlu0 %v1318_v56, %s1380_s21 }
 0x201   : > { %v1320_v57 = vpop.eup %1319 }
 0x202   : > { %554 = vrot.lane.b32.xlu1 %v1320_v57, %s1380_s21 }
 0x270   : > { %v553_v58 = vpop.permute.xlu0 %552 }
 0x271   : > { %v558_v60 = vmul.f32 %v553_v58, %v516_v41  ;;  %v416_v41 = vpop.f32.mrb[5].mxu0 }
 0x272   : > { %v417_v42 = vadd.f32 %v1489_v15, %v416_v41 }
 0x274   : > { %v555_v59 = vpop.permute.xlu1 %554 }
 0x275   : > { %v559_v61 = vmul.f32 %v555_v59, %v517_v43 }
 0x277   : > { %v564_v62 = vpack.c.bf16 %v559_v61, %v558_v60 }
 0x279   : > { %566 = vrot.lane.b32.xlu0 %v564_v62, %s1378_s18 }
 0x2eb   : > { %v567_v63 = vpop.permute.xlu0 %566 }
 0x2ec   : > { %1245 = vmatmul.mubr.msk.bf16.vlgmr.msra.gmra.mrb[4].mxu1 %vm463_vm3, %v567_v63 }
 0x2ed   : > { %1257 = vmatpush3.bf16.msra.mxu1 %v1457_v4  ;;  %1260 = vmatprep.mubr.msk.bf16.mxu1 %vm1377_vm2, %v1376_v2 }
 0x2ee   : > { %1258 = vmatprep.subr.bf16.mxu1 %v1376_v2  ;;  %v1231_v2 = vpop.f32.mrb[6].mxu0 }
 0x2ef   : > { %v428_v43 = vadd.f32 %v1231_v2, %v1489_v15  ;;  %v419_v44 = vpop.f32.mrb[7].mxu0 }
 0x2f0   : > { %v420_v45 = vadd.f32 %v1489_v15, %v419_v44 }
 0x2f1   : > { %1259 = vmatpush3.bf16.msra.mxu1 %v1465_v6  ;;  %v434_v46 = vpack.c.bf16 %v428_v43, %v425_v40 }
 0x2f2   : > { %v433_v47 = vpack.c.bf16 %v420_v45, %v417_v42 }
 0x2f4   : > { %v658_v49 = vunpack.c.l.bf16 %v433_v47  ;;  %v659_v53 = vunpack.c.h.bf16 %v433_v47 }
 0x3bf   : > { %v605_v1 = vpop.f32.mrb[4].mxu1 }
 0x3c0   : > { %v612_v3 = vadd.f32 %v605_v1, %v562_v0  ;;  %v1246_v5 = vpop.f32.mrb[5].mxu1 }
 0x3c1   : > { %v608_v8 = vpop.f32.mrb[6].mxu1 }
 0x3c2   : > { %v614_v9 = vmul.f32 %v612_v3, %v1497_v32  ;;  %v613_v10 = vadd.f32 %v608_v8, %v563_v7  ;;  %v1247_v11 = vpop.f32.mrb[7].mxu1 }
 0x3c4   : > { %1321 = vtanh.f32 %v614_v9  ;;  %v615_v4 = vmul.f32 %v613_v10, %v1497_v32 }
 0x3c6   : > { %1323 = vtanh.f32 %v615_v4 }
 0x3ce   : > { %v1322_v12 = vpop.eup %1321 }
 0x3cf   : > { %v618_v13 = vmul.f32 %v1322_v12, %v1497_v32 }
 0x3d0   : > { %v1324_v6 = vpop.eup %1323 }
 0x3d1   : > { %v620_v14 = vadd.f32 %v618_v13, %v1501_v38  ;;  %v619_v16 = vmul.f32 %v1324_v6, %v1497_v32 }
 0x3d3   : > { %626 = vrot.lane.b32.xlu1 %v620_v14, %s1380_s21  ;;  %v621_v17 = vadd.f32 %v619_v16, %v1501_v38  ;;  %v622_v22 = vmul.f32 %v620_v14, %v546_v52 }
 0x3d5   : > { %628 = vrot.lane.b32.xlu0 %v621_v17, %s1380_s21  ;;  %v623_v25 = vmul.f32 %v621_v17, %v547_v55 }
 0x445   : > { %v627_v18 = vpop.permute.xlu1 %626 }
 0x446   : > { %v632_v19 = vmul.f32 %v627_v18, %v620_v14 }
 0x447   : > { %v629_v20 = vpop.permute.xlu0 %628 }
 0x448   : > { %v633_v21 = vmul.f32 %v629_v20, %v621_v17  ;;  %636 = vrot.lane.b32.xlu1 %v632_v19, %s1378_s18  ;;  %v754_v20 = vunpack.c.l.bf16 %v434_v46 }
 0x44a   : > { %638 = vrot.lane.b32.xlu0 %v633_v21, %s1378_s18 }
 0x4ba   : > { %v637_v23 = vpop.permute.xlu1 %636 }
 0x4bb   : > { %v642_v24 = vadd.f32 %v637_v23, %v622_v22 }
 0x4bc   : > { %v639_v26 = vpop.permute.xlu0 %638 }
 0x4bd   : > { %1325 = vtanh.f32 %v642_v24  ;;  %v643_v27 = vadd.f32 %v639_v26, %v623_v25 }
 0x4bf   : > { %1327 = vtanh.f32 %v643_v27 }
 0x4c7   : > { %v1326_v30 = vpop.eup %1325 }
 0x4c8   : > { %648 = vrot.lane.b32.xlu1 %v1326_v30, %s1380_s21 }
 0x4c9   : > { %v1328_v31 = vpop.eup %1327 }
 0x4ca   : > { %650 = vrot.lane.b32.xlu0 %v1328_v31, %s1380_s21 }
 0x53a   : > { %v649_v33 = vpop.permute.xlu1 %648 }
 0x53b   : > { %v654_v35 = vmul.f32 %v649_v33, %v620_v14 }
 0x53c   : > { %v651_v34 = vpop.permute.xlu0 %650 }
 0x53d   : > { %v655_v36 = vmul.f32 %v651_v34, %v621_v17 }
 0x53f   : > { %v660_v37 = vpack.c.bf16 %v655_v36, %v654_v35 }
 0x541   : > { %662 = vrot.lane.b32.xlu1 %v660_v37, %s1378_s18 }
 0x5b3   : > { %v663_v48 = vpop.permute.xlu1 %662 }
 0x5b4   : > { %1253 = vmatmul.mubr.msk.bf16.vlgmr.msra.gmra.mrb[8].mxu0 %vm463_vm3, %v663_v48 }
 0x687   : > { %v701_v50 = vpop.f32.mrb[8].mxu0 }
 0x688   : > { %v708_v51 = vadd.f32 %v701_v50, %v658_v49  ;;  %v1254_v52 = vpop.f32.mrb[9].mxu0 }
 0x689   : > { %v704_v54 = vpop.f32.mrb[10].mxu0 }
 0x68a   : > { %v710_v55 = vmul.f32 %v708_v51, %v1497_v32  ;;  %v709_v56 = vadd.f32 %v704_v54, %v659_v53  ;;  %v1255_v57 = vpop.f32.mrb[11].mxu0 }
 0x68b   : > { %v1345_v57 = vld [vmem:[%s1637_s4] sm:$0xff] (!%p1183_p5)  }
 0x68c   : > { %1329 = vtanh.f32 %v710_v55  ;;  %v711_v58 = vmul.f32 %v709_v56, %v1497_v32 }
 0x68e   : > { %1331 = vtanh.f32 %v711_v58  ;;  %v1382_v58 = vmov (!%p1183_p5), 0.0  }
 0x68f   : > { %1264 = vmatprep.subr.bf16.mxu0 (!%p1183_p5), %v1382_v58  ;;  %1270 = vmatprep.subr.bf16.mxu1 (!%p1183_p5), %v1382_v58 }
 0x690   : > { %1265 = vmatpush3.bf16.msra.mxu0 (!%p1183_p5), %v1345_v57  ;;  %1266 = vmatprep.mubr.msk.bf16.mxu0 (!%p1183_p5), %vm1383_vm7, %v1382_v58 }
 0x691   : > { %1278 = vmatprep.subr.bf16.mxu0 (!%p1183_p5), %v1382_v58 }
 0x696   : > { %v1330_v15 = vpop.eup %1329 }
 0x697   : > { %v714_v59 = vmul.f32 %v1330_v15, %v1497_v32  ;;  %v1346_v15 = vld [vmem:[%s1446_s11 + $0x18] sm:$0xff] (!%p1183_p5)  }
 0x698   : > { %v1332_v60 = vpop.eup %1331  ;;  %1267 = vmatmul.mubr.msk.bf16.vlgmr.msra.gmra.mrb[0].mxu0 (!%p1183_p5), %vm353_vm1, %v1346_v15 }
 0x699   : > { %v716_v61 = vadd.f32 %v714_v59, %v1501_v38  ;;  %v715_v62 = vmul.f32 %v1332_v60, %v1497_v32  ;;  %1282 = vmatprep.mubr.msk.bf16.mxu0 (!%p1183_p5), %vm1383_vm7, %v1382_v58  ;;  %v1184_v59 = vld [vmem:[%s1638_s5] ss:$0 sm:$0xff] (!%p1183_p5) }
 0x69b   : > { %722 = vrot.lane.b32.xlu0 %v716_v61, %s1380_s21  ;;  %v717_v63 = vadd.f32 %v715_v62, %v1501_v38  ;;  %v718_v7 = vmul.f32 %v716_v61, %v642_v24  ;;  %v755_v24 = vunpack.c.h.bf16 %v434_v46 }
 0x69d   : > { %724 = vrot.lane.b32.xlu1 %v717_v63, %s1380_s21  ;;  %v719_v10 = vmul.f32 %v717_v63, %v643_v27 }
 0x70d   : > { %v723_v0 = vpop.permute.xlu0 %722 }
 0x70e   : > { %v728_v1 = vmul.f32 %v723_v0, %v716_v61 }
 0x70f   : > { %v725_v3 = vpop.permute.xlu1 %724 }
 0x710   : > { %v729_v5 = vmul.f32 %v725_v3, %v717_v63  ;;  %732 = vrot.lane.b32.xlu0 %v728_v1, %s1378_s18 }
 0x712   : > { %734 = vrot.lane.b32.xlu1 %v729_v5, %s1378_s18 }
 0x76b   : > { %v931_v60 = vpop.f32.mrb[0].mxu0 (!%p1183_p5) }
 0x76c   : > { %v1268_v62 = vpop.f32.mrb[1].mxu0 (!%p1183_p5) }
 0x782   : > { %v733_v8 = vpop.permute.xlu0 %732 }
 0x783   : > { %v738_v9 = vadd.f32 %v733_v8, %v718_v7 }
 0x784   : > { %v735_v11 = vpop.permute.xlu1 %734 }
 0x785   : > { %1333 = vtanh.f32 %v738_v9  ;;  %v739_v4 = vadd.f32 %v735_v11, %v719_v10 }
 0x787   : > { %1335 = vtanh.f32 %v739_v4 }
 0x78f   : > { %v1334_v12 = vpop.eup %1333 }
 0x790   : > { %744 = vrot.lane.b32.xlu0 %v1334_v12, %s1380_s21 }
 0x791   : > { %v1336_v13 = vpop.eup %1335 }
 0x792   : > { %746 = vrot.lane.b32.xlu1 %v1336_v13, %s1380_s21 }
 0x802   : > { %v745_v6 = vpop.permute.xlu0 %744 }
 0x803   : > { %v750_v16 = vmul.f32 %v745_v6, %v716_v61  ;;  %v932_v61 = vadd.f32 (!%p1183_p5), %v1184_v59, %v931_v60 }
 0x804   : > { %v747_v14 = vpop.permute.xlu1 %746 }
 0x805   : > { %v751_v17 = vmul.f32 %v747_v14, %v717_v63  ;;  %v934_v63 = vpop.f32.mrb[2].mxu0 (!%p1183_p5)  ;;  %v938_v0 = vmul.f32 (!%p1183_p5), %v932_v61, %v1497_v32 }
 0x806   : > { %v935_v1 = vadd.f32 (!%p1183_p5), %v1184_v59, %v934_v63  ;;  %v1269_v3 = vpop.f32.mrb[3].mxu0 (!%p1183_p5) }
 0x807   : > { %v756_v18 = vpack.c.bf16 %v751_v17, %v750_v16  ;;  %v1347_v16 = vld [vmem:[%s1639_s6] sm:$0xff] (!%p1183_p5)   ;;  %v1350_v17 = vld [vmem:[%s1639_s6 + $0x18] sm:$0xff] (!%p1183_p5)  }
 0x808   : > { %v939_v5 = vmul.f32 (!%p1183_p5), %v935_v1, %v1497_v32  ;;  %1279 = vmatpush3.bf16.msra.mxu0 (!%p1183_p5), %v1347_v16 }
 0x809   : > { %758 = vrot.lane.b32.xlu0 %v756_v18, %s1378_s18  ;;  %1280 = vmatprep.subr.bf16.mxu0 (!%p1183_p5), %v1382_v58 }
 0x87b   : > { %v759_v19 = vpop.permute.xlu0 %758 }
 0x87c   : > { %1261 = vmatmul.mubr.msk.bf16.vlgmr.msra.gmra.mrb[8].mxu1 %vm463_vm3, %v759_v19 }
 0x87d   : > { %1274 = vmatprep.mubr.msk.bf16.mxu1 (!%p1183_p5), %vm1383_vm7, %v1382_v58 }
 0x94f   : > { %v797_v21 = vpop.f32.mrb[8].mxu1 }
 0x950   : > { %v804_v22 = vadd.f32 %v797_v21, %v754_v20  ;;  %v1262_v23 = vpop.f32.mrb[9].mxu1 }
 0x951   : > { %v800_v25 = vpop.f32.mrb[10].mxu1 }
 0x952   : > { %v806_v26 = vmul.f32 %v804_v22, %v1497_v32  ;;  %v805_v27 = vadd.f32 %v800_v25, %v755_v24  ;;  %v1263_v28 = vpop.f32.mrb[11].mxu1 }
 0x954   : > { %1337 = vtanh.f32 %v806_v26  ;;  %v807_v29 = vmul.f32 %v805_v27, %v1497_v32 }
 0x956   : > { %1339 = vtanh.f32 %v807_v29 }
 0x95e   : > { %v1338_v30 = vpop.eup %1337 }
 0x95f   : > { %v810_v31 = vmul.f32 %v1338_v30, %v1497_v32 }
 0x960   : > { %v1340_v33 = vpop.eup %1339 }
 0x961   : > { %v812_v34 = vadd.f32 %v810_v31, %v1501_v38  ;;  %v811_v35 = vmul.f32 %v1340_v33, %v1497_v32 }
 0x963   : > { %818 = vrot.lane.b32.xlu1 %v812_v34, %s1380_s21  ;;  %v813_v36 = vadd.f32 %v811_v35, %v1501_v38  ;;  %v814_v42 = vmul.f32 %v812_v34, %v738_v9 }
 0x965   : > { %820 = vrot.lane.b32.xlu0 %v813_v36, %s1380_s21  ;;  %v815_v44 = vmul.f32 %v813_v36, %v739_v4 }
 0x9d5   : > { %v819_v37 = vpop.permute.xlu1 %818 }
 0x9d6   : > { %v824_v39 = vmul.f32 %v819_v37, %v812_v34 }
 0x9d7   : > { %v821_v40 = vpop.permute.xlu0 %820 }
 0x9d8   : > { %v825_v41 = vmul.f32 %v821_v40, %v813_v36  ;;  %828 = vrot.lane.b32.xlu1 %v824_v39, %s1378_s18 }
 0x9da   : > { %830 = vrot.lane.b32.xlu0 %v825_v41, %s1378_s18 }
 0xa4a   : > { %v829_v2 = vpop.permute.xlu1 %828 }
 0xa4b   : > { %v834_v43 = vadd.f32 %v829_v2, %v814_v42 }
 0xa4c   : > { %v831_v45 = vpop.permute.xlu0 %830 }
 0xa4d   : > { %1341 = vtanh.f32 %v834_v43  ;;  %v835_v46 = vadd.f32 %v831_v45, %v815_v44 }
 0xa4f   : > { %1343 = vtanh.f32 %v835_v46 }
 0xa50   : > { %1351 = vtanh.f32 (!%p1183_p5), %v938_v0 }
 0xa51   : > { %1353 = vtanh.f32 (!%p1183_p5), %v939_v5 }
 0xa57   : > { %v1342_v47 = vpop.eup %1341 }
 0xa58   : > { %840 = vrot.lane.b32.xlu1 %v1342_v47, %s1380_s21 }
 0xa59   : > { %v1344_v48 = vpop.eup %1343 }
 0xa5a   : > { %842 = vrot.lane.b32.xlu0 %v1344_v48, %s1380_s21  ;;  %v1352_v7 = vpop.eup (!%p1183_p5), %1351 }
 0xa5b   : > { %v942_v8 = vmul.f32 (!%p1183_p5), %v1352_v7, %v1497_v32  ;;  %v1354_v9 = vpop.eup (!%p1183_p5), %1353 }
 0xa5c   : > { %v943_v10 = vmul.f32 (!%p1183_p5), %v1354_v9, %v1497_v32  ;;  %v1348_v32 = vld [vmem:[%s1639_s6 + $0x10] sm:$0xff] (!%p1183_p5)  }
 0xa5d   : > { %v944_v11 = vadd.f32 (!%p1183_p5), %v942_v8, %v1501_v38  ;;  %1271 = vmatpush3.bf16.msra.mxu1 (!%p1183_p5), %v1348_v32 }
 0xa5e   : > { %v945_v4 = vadd.f32 (!%p1183_p5), %v943_v10, %v1501_v38  ;;  %v1349_v38 = vld [vmem:[%s1639_s6 + $0x8] sm:$0xff] (!%p1183_p5)   ;;  %1272 = vmatprep.subr.bf16.mxu1 (!%p1183_p5), %v1382_v58 }
 0xa5f   : > { %1281 = vmatpush3.bf16.msra.mxu0 (!%p1183_p5), %v1349_v38 }
 0xa61   : > { %1273 = vmatpush3.bf16.msra.mxu1 (!%p1183_p5), %v1350_v17 }
 0xaca   : > { %v841_v49 = vpop.permute.xlu1 %840 }
 0xacb   : > { %v1572_v50 = vmul.f32 %v841_v49, %v812_v34  ;;  %v1194_v34 = vld [vmem:[%s1640_s7] ss:$0 sm:$0xff] (!%p1183_p5) }
 0xacc   : > { %v843_v51 = vpop.permute.xlu0 %842 }
 0xacd   : > { %v1574_v52 = vmul.f32 %v843_v51, %v813_v36  ;;  %850 = vrot.lane.b32.xlu1 %v1572_v50, %s1378_s18 }
 0xacf   : > { %852 = vrot.lane.b32.xlu0 %v1574_v52, %s1378_s18  ;;  %v976_v20 = vpack.c.bf16 (!%p1183_p5), %v1574_v52, %v1572_v50 }
 0xad1   : > { %860 = vrot.lane.b32.xlu1 %v834_v43, %s1381_s22 }
 0xad3   : > { %862 = vrot.lane.b32.xlu0 %v835_v46, %s1381_s22 }
 0xad7   : > { %948 = vrot.lane.b32.xlu0 (!%p1183_p5), %v944_v11, %s1384_s28 }
 0xadb   : > { %950 = vrot.lane.b32.xlu0 (!%p1183_p5), %v945_v4, %s1384_s28 }
 0xb3f   : > { %v851_v53 = vpop.permute.xlu1 %850 }
 0xb40   : > { %856 = vst.msk [vmem:[#allocation3] sm:$0xff] %vm463_vm3, %v851_v53  ;;  %871 = sbr.rel (%p1183_p5) target bundleno = 3678 (0xe5e), region = 60 }
 0xb41   : > { %v853_v54 = vpop.permute.xlu0 %852 }
 0xb42   : > { %857 = vst.msk [vmem:[#allocation3 + $0x8] sm:$0xff] %vm463_vm3, %v853_v54 }
 0xb43   : > { %v861_v55 = vpop.permute.xlu1 %860 }
 0xb44   : > { %866 = vst.msk [vmem:[#allocation4] sm:$0xff] %vm463_vm3, %v861_v55 }
 0xb45   : > { %v863_v56 = vpop.permute.xlu0 %862 }
 0xb46   : > { %867 = vst.msk [vmem:[#allocation4 + $0x8] sm:$0xff] %vm463_vm3, %v863_v56 }
 0xb49   : > { %v949_v12 = vpop.permute.xlu0 %948 }
 0xb4a   : > { %v954_v13 = vmul.f32 %v949_v12, %v944_v11 }
 0xb4c   : > { %1355 = vtanh.f32 %v954_v13 }
 0xb4d   : > { %v951_v6 = vpop.permute.xlu0 %950 }
 0xb4e   : > { %v955_v14 = vmul.f32 %v951_v6, %v945_v4 }
 0xb50   : > { %1357 = vtanh.f32 %v955_v14 }
 0xb56   : > { %v1356_v18 = vpop.eup %1355 }
 0xb57   : > { %960 = vrot.lane.b32.xlu1 %v1356_v18, %s1385_s15 }
 0xb5a   : > { %v1358_v19 = vpop.eup %1357 }
 0xb5b   : > { %962 = vrot.lane.b32.xlu1 %v1358_v19, %s1385_s15 }
 0xb5f   : > { %1038 = vrot.lane.b32.xlu1 %v976_v20, %s1386_s16 }
 0xbc9   : > { %v961_v21 = vpop.permute.xlu1 %960 }
 0xbca   : > { %v966_v23 = vmul.f32 %v961_v21, %v944_v11 }
 0xbcd   : > { %v963_v22 = vpop.permute.xlu1 %962 }
 0xbce   : > { %v967_v24 = vmul.f32 %v963_v22, %v945_v4 }
 0xbd0   : > { %v977_v25 = vpack.c.bf16 %v967_v24, %v966_v23 }
 0xbd1   : > { %v1039_v26 = vpop.permute.xlu1 %1038 }
 0xbd2   : > { %979 = vrot.lane.b32.xlu0 %v977_v25, %s1386_s16  ;;  %1283 = vmatmul.mubr.msk.bf16.vlgmr.msra.gmra.mrb[4].mxu0 %vm463_vm3, %v1039_v26 }
 0xc44   : > { %v980_v27 = vpop.permute.xlu0 %979 }
 0xc45   : > { %1275 = vmatmul.mubr.msk.bf16.vlgmr.msra.gmra.mrb[0].mxu1 %vm463_vm3, %v980_v27 }
 0xca5   : > { %v1089_v28 = vpop.f32.mrb[4].mxu0 }
 0xca6   : > { %v1284_v29 = vpop.f32.mrb[5].mxu0 }
 0xca7   : > { %v1092_v30 = vpop.f32.mrb[6].mxu0 }
 0xca8   : > { %v1285_v31 = vpop.f32.mrb[7].mxu0 }
 0xd18   : > { %v1030_v33 = vpop.f32.mrb[0].mxu1 }
 0xd19   : > { %v1090_v35 = vadd.f32 %v1089_v28, %v1030_v33  ;;  %v1276_v36 = vpop.f32.mrb[1].mxu1 }
 0xd1a   : > { %v1033_v37 = vpop.f32.mrb[2].mxu1 }
 0xd1b   : > { %v1093_v39 = vadd.f32 %v1092_v30, %v1033_v37  ;;  %v1277_v40 = vpop.f32.mrb[3].mxu1  ;;  %v1103_v41 = vadd.f32 %v1194_v34, %v1090_v35 }
 0xd1d   : > { %v1106_v42 = vsel %vm1105_vm8, %v1103_v41, -inf  ;;  %v1104_v2 = vadd.f32 %v1194_v34, %v1093_v39 }
 0xd1e   : > { %1107 = vmax.xlane.f32.xlu0 %v1106_v42 }
 0xd1f   : > { %v1109_v43 = vsel %vm1105_vm8, %v1104_v2, -inf }
 0xd20   : > { %1110 = vmax.xlane.f32.xlu1 %v1109_v43 }
 0xdab   : > { %v1108_v44 = vpop.xlane.xlu0 %1107 }
 0xdac   : > { %v1112_v45 = vsub.f32 %v1103_v41, %v1108_v44 }
 0xdad   : > { %v1111_v46 = vpop.xlane.xlu1 %1110 }
 0xdae   : > { %v1114_v47 = vmul.f32 1.442695, %v1112_v45  ;;  %v1113_v48 = vsub.f32 %v1104_v2, %v1111_v46 }
 0xdb0   : > { %1359 = vpow2.f32 %v1114_v47  ;;  %v1116_v49 = vmul.f32 1.442695, %v1113_v48 }
 0xdb2   : > { %1361 = vpow2.f32 %v1116_v49 }
 0xdba   : > { %v1360_v50 = vpop.eup %1359 }
 0xdbb   : > { %v1118_v51 = vsel %vm1105_vm8, %v1360_v50, 0.0 }
 0xdbc   : > { %v1362_v52 = vpop.eup %1361  ;;  %1119 = vadd.xlane.f32.xlu0 %v1118_v51 }
 0xdbd   : > { %v1121_v53 = vsel %vm1105_vm8, %v1362_v52, 0.0 }
 0xdc0   : > { %1122 = vadd.xlane.f32.xlu0 %v1121_v53 }
 0xe49   : > { %v1120_v54 = vpop.xlane.xlu0 %1119 }
 0xe4a   : > { %1363 = vlog2.f32 %v1120_v54 }
 0xe4d   : > { %v1123_v55 = vpop.xlane.xlu0 %1122 }
 0xe4e   : > { %1365 = vlog2.f32 %v1123_v55 }
 0xe54   : > { %v1364_v56 = vpop.eup %1363 }
 0xe55   : > { %v1125_v57 = vmul.f32 0.6931472, %v1364_v56 }
 0xe57   : > { %v1128_v58 = vsub.f32 %v1112_v45, %v1125_v57 }
 0xe58   : > { %v1366_v15 = vpop.eup %1365 }
 0xe59   : > { %1130 = vst.msk [vmem:[%s1641_s8] sm:$0xff] %vm1105_vm8, %v1128_v58  ;;  %v1127_v59 = vmul.f32 0.6931472, %v1366_v15 }
 0xe5b   : > { %v1129_v60 = vsub.f32 %v1113_v48, %v1127_v59 }
 0xe5d   : > { %1131 = vst.msk [vmem:[%s1641_s8 + $0x8] sm:$0xff] %vm1105_vm8, %v1129_v60 }
 0xe5e PF: > { %s18_s27 = sadd.s32 1, %s1373_s27  }
 0xe5f   : > { %p15_p6 = scmp.ge.s32.totalorder %s18_s27, 4  }
 0xe61   :  { %17 = sbr.rel (!%p15_p6) target bundleno = 1 (0x1), region = 89 }

</bundles_post_ra>
